<compile_context>
chip_gen: v6e
topology: v6e:2x2x1
jax: 0.10.0
libtpu: 0.0.40
codegen_flags: <defaults>
</compile_context>

<pallas_src>
import functools

import jax
import jax.numpy as jnp
from jax import lax
from jax.experimental import pallas as pl
from jax.experimental.pallas import tpu as pltpu

_SUBLANE = 8          # f32 sublane group
_SUB_BF16 = 16        # bf16 packed sublane group
_LANE = 128


def _round_up(x, m):
    return (x + m - 1) // m * m


def _param_layout(state_size, fc1_units, fc2_units, action_size):
    """Sublane-aligned row offsets + padded extents for the packed bf16 slab."""
    Sp = _round_up(max(state_size, 1), _SUB_BF16)     # contraction rows of W1
    F1p = _round_up(fc1_units, _LANE)                 # lanes of hidden 1
    F2p = _round_up(fc2_units, _LANE)                 # lanes of hidden 2
    Hp = _round_up(2 * action_size, _LANE)            # lanes of fused mu|sigma head
    width = max(F1p, F2p, Hp)

    offs = {}
    off = 0
    for name, nrows in (("w1", Sp), ("b1", _SUB_BF16),
                        ("w2", F1p), ("b2", _SUB_BF16),
                        ("wh", F2p), ("bh", _SUB_BF16)):
        offs[name] = off
        off += nrows
    return offs, off, width, (Sp, F1p, F2p, Hp)


def pack_actor_params(params):
    """Pack all weights/biases into ONE bf16 slab (single HBM->VMEM DMA).

    Weights are stored (in_features, out_features); biases (1, out_features).
    mu / sigma head weights & biases are fused column-wise.  Every segment is
    zero-padded to full (sublane, 128) tiles so the kernel only takes whole-
    tile views and the padding contributes 0 to every matmul.
    Returns (packed_slab_bf16, dims) with dims=(state, fc1, fc2, action).
    """
    w1, b1 = params["w1"], params["b1"]
    w2, b2 = params["w2"], params["b2"]
    S, F1 = w1.shape
    F2 = w2.shape[1]
    A = params["wmu"].shape[1]
    offs, total_rows, width, _ = _param_layout(S, F1, F2, A)

    wh = jnp.concatenate([params["wmu"], params["wsig"]], axis=1)   # (F2, 2A)
    bh = jnp.concatenate([params["bmu"], params["bsig"]], axis=1)   # (1, 2A)

    buf = jnp.zeros((total_rows, width), jnp.float32)
    buf = buf.at[offs["w1"]:offs["w1"] + S, :F1].set(w1.astype(jnp.float32))
    buf = buf.at[offs["b1"], :F1].set(b1.reshape(F1).astype(jnp.float32))
    buf = buf.at[offs["w2"]:offs["w2"] + F1, :F2].set(w2.astype(jnp.float32))
    buf = buf.at[offs["b2"], :F2].set(b2.reshape(F2).astype(jnp.float32))
    buf = buf.at[offs["wh"]:offs["wh"] + F2, :2 * A].set(wh.astype(jnp.float32))
    buf = buf.at[offs["bh"], :2 * A].set(bh.reshape(2 * A).astype(jnp.float32))
    return buf.astype(jnp.bfloat16), (int(S), int(F1), int(F2), int(A))


def _actor_kernel(s_ref, p_ref, o_ref, *, dims, offs, pads):
    S, F1, F2, A = dims
    Sp, F1p, F2p, Hp = pads

    x = s_ref[...]                                   # (bb, Sp) bf16

    # fc1 + tanh   (whole-tile weight views; padded rows/cols are zero)
    w1 = p_ref[pl.ds(offs["w1"], Sp), pl.ds(0, F1p)]
    b1 = p_ref[pl.ds(offs["b1"], 1), pl.ds(0, F1p)].astype(jnp.float32)
    h = jnp.tanh(jnp.dot(x, w1, preferred_element_type=jnp.float32) + b1)
    h = h.astype(jnp.bfloat16)                       # back to native MXU input

    # fc2 + tanh
    w2 = p_ref[pl.ds(offs["w2"], F1p), pl.ds(0, F2p)]
    b2 = p_ref[pl.ds(offs["b2"], 1), pl.ds(0, F2p)].astype(jnp.float32)
    h = jnp.tanh(jnp.dot(h, w2, preferred_element_type=jnp.float32) + b2)
    h = h.astype(jnp.bfloat16)

    # fused mu|sigma head: one matmul, one lane-dense 128-wide output
    wh = p_ref[pl.ds(offs["wh"], F2p), pl.ds(0, Hp)]
    bh = p_ref[pl.ds(offs["bh"], 1), pl.ds(0, Hp)].astype(jnp.float32)
    head = jnp.dot(h, wh, preferred_element_type=jnp.float32) + bh   # (bb, Hp) f32

    # lanes [0, A) -> tanh (mu); lanes [A, ..) -> exp(-relu) (sigma & padding).
    # Lane-index select: no lane shuffles, both transcendentals run on the EUP.
    lane = lax.broadcasted_iota(jnp.int32, head.shape, 1)
    out = jnp.where(lane < A,
                    jnp.tanh(head),
                    jnp.exp(-jnp.maximum(head, 0.0)))
    o_ref[...] = out.astype(o_ref.dtype)             # full-width unmasked store


@functools.partial(jax.jit, static_argnames=("dims", "block_b"))
def actor_net_forward(state, packed, dims, block_b=512):
    """ActorNet forward pass in one Pallas kernel.

    state:  (B, state_size) float32 (or bf16)
    packed: bf16 parameter slab from pack_actor_params
    dims:   (state_size, fc1_units, fc2_units, action_size)  (static)
    Returns (mu, sigma), each (B, action_size) float32.
    """
    S, F1, F2, A = dims
    offs, total_rows, width, pads = _param_layout(S, F1, F2, A)
    Sp, F1p, F2p, Hp = pads
    assert packed.shape == (total_rows, width) and packed.dtype == jnp.bfloat16
    assert state.shape[1] == S

    B = state.shape[0]
    B8 = _round_up(B, _SUBLANE)
    nsteps = pl.cdiv(B8, int(block_b))
    # Guarantee >=2 "parallel" steps when the batch spans more than one sublane
    # group, so both v7x TensorCores get work (harmless on v5e/v6e).
    if nsteps == 1 and B8 >= 2 * _SUBLANE:
        nsteps = 2
    bb = _round_up(pl.cdiv(B8, nsteps), _SUBLANE)     # batch tile (rows)
    Bp = bb * nsteps                                   # pads < 8*nsteps dead rows

    # bf16 MXU input stream; pad batch rows + contraction lanes (zeros).
    x = jnp.pad(state.astype(jnp.bfloat16), ((0, Bp - B), (0, Sp - S)))

    out = pl.pallas_call(
        functools.partial(_actor_kernel, dims=dims, offs=offs, pads=pads),
        out_shape=jax.ShapeDtypeStruct((Bp, Hp), jnp.float32),
        grid=(nsteps,),
        in_specs=[
            pl.BlockSpec((bb, Sp), lambda i: (i, 0)),            # batch tile
            pl.BlockSpec((total_rows, width), lambda i: (0, 0)),  # resident weights
        ],
        out_specs=pl.BlockSpec((bb, Hp), lambda i: (i, 0)),       # lane-dense out
        compiler_params=pltpu.CompilerParams(
            dimension_semantics=("parallel",)),   # shards batch across v7x TCs
    )(x, packed)

    mu = out[:B, :A]
    sigma = out[:B, A:2 * A]
    return mu, sigma


def init_actor_params(key, state_size, action_size, fc1_units, fc2_units):
    """Deterministic init mirroring ActorNet.reset_parameters().

    PyTorch's hidden_init uses weight.size()[0] (= out_features) as "fan_in";
    we reproduce that quirk for the uniform limits, and PyTorch's default bias
    init (U(-1/sqrt(in_features), +1/sqrt(in_features))) for the biases.
    """
    ks = jax.random.split(key, 8)

    def uni(k, shape, lim):
        return jax.random.uniform(k, shape, jnp.float32, -lim, lim)

    lim1 = 1.0 / jnp.sqrt(jnp.float32(fc1_units))
    lim2 = 1.0 / jnp.sqrt(jnp.float32(fc2_units))

    return {
        # weights stored (in, out) == transposed nn.Linear layout
        "w1": uni(ks[0], (state_size, fc1_units), lim1),
        "b1": uni(ks[1], (1, fc1_units), 1.0 / jnp.sqrt(jnp.float32(state_size))),
        "w2": uni(ks[2], (fc1_units, fc2_units), lim2),
        "b2": uni(ks[3], (1, fc2_units), 1.0 / jnp.sqrt(jnp.float32(fc1_units))),
        "wmu": uni(ks[4], (fc2_units, action_size), 0.003),
        "bmu": uni(ks[5], (1, action_size), 1.0 / jnp.sqrt(jnp.float32(fc2_units))),
        "wsig": uni(ks[6], (fc2_units, action_size), 0.003),
        "bsig": uni(ks[7], (1, action_size), 1.0 / jnp.sqrt(jnp.float32(fc2_units))),
    }


if __name__ == "__main__":
    key = jax.random.PRNGKey(0)
    k_param, k_state = jax.random.split(key)

    # Small shapes consistent with the module; B=8 fills one f32 sublane group.
    B, state_size, action_size = 8, 16, 8
    fc1_units, fc2_units = 64, 32

    params = init_actor_params(k_param, state_size, action_size,
                               fc1_units, fc2_units)
    packed, dims = pack_actor_params(params)
    state = jax.random.normal(k_state, (B, state_size), jnp.float32)

    mu, sigma = actor_net_forward(state, packed, dims)
    jax.block_until_ready((mu, sigma))

    # Reference check in plain f32 JAX (unfused, unpadded weights).  The kernel
    # feeds the MXU bf16 inputs with f32 accumulation, so allow bf16-roundoff
    # tolerance.
    x = jnp.tanh(state @ params["w1"] + params["b1"])
    x = jnp.tanh(x @ params["w2"] + params["b2"])
    mu_ref = jnp.tanh(x @ params["wmu"] + params["bmu"])
    sigma_ref = jnp.exp(-jnp.maximum(x @ params["wsig"] + params["bsig"], 0.0))

    assert mu.shape == (B, action_size) and sigma.shape == (B, action_size)
    assert jnp.allclose(mu, mu_ref, atol=2e-2, rtol=2e-2)
    assert jnp.allclose(sigma, sigma_ref, atol=2e-2, rtol=2e-2)
    assert bool(jnp.all(sigma > 0.0)) and bool(jnp.all(sigma <= 1.0))

    print("KERNEL_OK")
</pallas_src>

<mosaic_0001>
module attributes {stable_mosaic.version = 11 : i64} {
  func.func @_actor_kernel(%arg0: i32, %arg1: memref<8x16xbf16, #tpu.memory_space<vmem>>, %arg2: memref<320x128xbf16, #tpu.memory_space<vmem>>, %arg3: memref<8x128xf32, #tpu.memory_space<vmem>>) attributes {dimension_semantics = [#tpu.dimension_semantics<parallel>], iteration_bounds = array<i64: 1>, scalar_prefetch = 0 : i64, scratch_operands = 0 : i64, tpu.core_type = #tpu.core_type<tc>, window_params = [{transform_indices = @transform_0, window_bounds = array<i64: 8, 16>}, {pipeline_mode = #tpu.pipeline_mode<synchronous>, transform_indices = @transform_1, window_bounds = array<i64: 320, 128>}, {transform_indices = @transform_2, window_bounds = array<i64: 8, 128>}]} {
    %c0 = arith.constant 0 : index
    %c0_0 = arith.constant 0 : index
    %0 = vector.load %arg1[%c0, %c0_0] : memref<8x16xbf16, #tpu.memory_space<vmem>>, vector<8x16xbf16>
    %c0_1 = arith.constant 0 : index
    %c0_2 = arith.constant 0 : index
    %1 = vector.load %arg2[%c0_1, %c0_2] : memref<320x128xbf16, #tpu.memory_space<vmem>>, vector<16x128xbf16>
    %c16 = arith.constant 16 : index
    %c0_3 = arith.constant 0 : index
    %2 = vector.load %arg2[%c16, %c0_3] : memref<320x128xbf16, #tpu.memory_space<vmem>>, vector<1x128xbf16>
    %3 = arith.extf %2 : vector<1x128xbf16> to vector<1x128xf32>
    %cst = arith.constant dense<0.000000e+00> : vector<8x128xf32>
    %4 = tpu.matmul %0, %1, %cst {dimension_numbers = #tpu.dot_dimension_numbers<[1], [0], [0], [1], [0, 0, 1, 1], [], []>} : vector<8x16xbf16>, vector<16x128xbf16>, vector<8x128xf32> -> vector<8x128xf32>
    %5 = vector.broadcast %3 : vector<1x128xf32> to vector<8x128xf32>
    %6 = arith.addf %4, %5 : vector<8x128xf32>
    %7 = math.tanh %6 : vector<8x128xf32>
    %8 = arith.truncf %7 : vector<8x128xf32> to vector<8x128xbf16>
    %c32 = arith.constant 32 : index
    %c0_4 = arith.constant 0 : index
    %9 = vector.load %arg2[%c32, %c0_4] : memref<320x128xbf16, #tpu.memory_space<vmem>>, vector<128x128xbf16>
    %c160 = arith.constant 160 : index
    %c0_5 = arith.constant 0 : index
    %10 = vector.load %arg2[%c160, %c0_5] : memref<320x128xbf16, #tpu.memory_space<vmem>>, vector<1x128xbf16>
    %11 = arith.extf %10 : vector<1x128xbf16> to vector<1x128xf32>
    %cst_6 = arith.constant dense<0.000000e+00> : vector<8x128xf32>
    %12 = tpu.matmul %8, %9, %cst_6 {dimension_numbers = #tpu.dot_dimension_numbers<[1], [0], [0], [1], [0, 0, 1, 1], [], []>} : vector<8x128xbf16>, vector<128x128xbf16>, vector<8x128xf32> -> vector<8x128xf32>
    %13 = vector.broadcast %11 : vector<1x128xf32> to vector<8x128xf32>
    %14 = arith.addf %12, %13 : vector<8x128xf32>
    %15 = math.tanh %14 : vector<8x128xf32>
    %16 = arith.truncf %15 : vector<8x128xf32> to vector<8x128xbf16>
    %c176 = arith.constant 176 : index
    %c0_7 = arith.constant 0 : index
    %17 = vector.load %arg2[%c176, %c0_7] : memref<320x128xbf16, #tpu.memory_space<vmem>>, vector<128x128xbf16>
    %c304 = arith.constant 304 : index
    %c0_8 = arith.constant 0 : index
    %18 = vector.load %arg2[%c304, %c0_8] : memref<320x128xbf16, #tpu.memory_space<vmem>>, vector<1x128xbf16>
    %19 = arith.extf %18 : vector<1x128xbf16> to vector<1x128xf32>
    %cst_9 = arith.constant dense<0.000000e+00> : vector<8x128xf32>
    %20 = tpu.matmul %16, %17, %cst_9 {dimension_numbers = #tpu.dot_dimension_numbers<[1], [0], [0], [1], [0, 0, 1, 1], [], []>} : vector<8x128xbf16>, vector<128x128xbf16>, vector<8x128xf32> -> vector<8x128xf32>
    %21 = vector.broadcast %19 : vector<1x128xf32> to vector<8x128xf32>
    %22 = arith.addf %20, %21 : vector<8x128xf32>
    %23 = tpu.iota {dimensions = array<i32: 1>} : vector<8x128xi32>
    %c8_i32 = arith.constant 8 : i32
    %24 = vector.broadcast %c8_i32 : i32 to vector<8x128xi32>
    %25 = arith.cmpi slt, %23, %24 : vector<8x128xi32>
    %26 = math.tanh %22 : vector<8x128xf32>
    %cst_10 = arith.constant 0.000000e+00 : f32
    %27 = vector.broadcast %cst_10 : f32 to vector<8x128xf32>
    %28 = arith.maximumf %22, %27 : vector<8x128xf32>
    %cst_11 = arith.constant 0.000000e+00 : f32
    %29 = vector.broadcast %cst_11 : f32 to vector<8x128xf32>
    %30 = arith.subf %29, %28 : vector<8x128xf32>
    %31 = math.exp %30 : vector<8x128xf32>
    %32 = arith.select %25, %26, %31 : vector<8x128xi1>, vector<8x128xf32>
    %c0_12 = arith.constant 0 : index
    %c0_13 = arith.constant 0 : index
    %33 = vector.load %arg3[%c0_12, %c0_13] : memref<8x128xf32, #tpu.memory_space<vmem>>, vector<8x128xf32>
    tpu.vector_store %arg3[%c0_12, %c0_13], %32 {strides = array<i32>} : memref<8x128xf32, #tpu.memory_space<vmem>>, vector<8x128xf32>,
    return
  }
  func.func @transform_0(%arg0: i32) -> (i32, i32) {
    %c0_i32 = arith.constant 0 : i32
    %c0_i32_0 = arith.constant 0 : i32
    return %arg0, %c0_i32 : i32, i32
  }
  func.func @transform_1(%arg0: i32) -> (i32, i32) {
    %c0_i32 = arith.constant 0 : i32
    %c0_i32_0 = arith.constant 0 : i32
    %c0_i32_1 = arith.constant 0 : i32
    return %c0_i32, %c0_i32_0 : i32, i32
  }
  func.func @transform_2(%arg0: i32) -> (i32, i32) {
    %c0_i32 = arith.constant 0 : i32
    %c0_i32_0 = arith.constant 0 : i32
    return %arg0, %c0_i32 : i32, i32
  }
}

</mosaic_0001>

<bundles_post_ra>
// kernel: actor_net_forward.1
= control target key start
LH: loop header
LB: loop body
LE: loop exit
PB: predicated region body
PF: predicated region fallthrough
CT: control target
= control target key end

     0   :  { %7 = vsyncpa [#allocation3], 0  ;;  %s460_s9 = smov [#allocation2]   ;;  %s509_s0 = inlined_call_operand.vmem [shape: bf16[8,16], index: 0, kind: input, shape index: {}]   ;;  %s510_s1 = inlined_call_operand.hbm [shape: bf16[320,128], index: 1, kind: input, shape index: {}]   ;;  %s511_s2 = inlined_call_operand.vmem [shape: f32[8,128], index: 2, kind: output, shape index: {}]  }
   0x1   :  { %s15_s10 = sshll.u32 %s460_s9, 4  ;;  %s16_s10 = int_to_ptr.vmem [resolvable:$true] %s15_s10 }
   0x2   :  { %s446_s11 = scalar_lea.vmem %s16_s10, 2560  ;;  %p451_p1 = scmp.lt.s32.totalorder %s16_s10, %s16_s10 }
   0x3   :  { %p447_p0 = scmp.ne.s32.totalorder %s16_s10, %s446_s11  ;;  %p452_p2 = scmp.lt.s32.totalorder %s446_s11, %s446_s11 }
   0x5   :  { %p453_p3 = por %p452_p2, %p451_p1 }
   0x7   :  { %p454_p4 = pnand %p453_p3, %p447_p0 }
   0x9   :  { %457 = shalt.err (!%p454_p4)
}
   0xa   :  { %s461_s12 = smov 64   ;;  %s462_s13 = smov 4  }
   0xb   :  { %21 = dma.hbm_to_vmem [thread:$0]  %s510_s1, 2560, %s16_s10, [#allocation3], %s461_s12, %s461_s12, %s462_s13  }
   0xc   :  { %458 = dma.done.wait [#allocation3], 2560  }
   0xd   :  { %459 = vsyncadd [#allocation3], 4294964736  ;;  %v463_v0 = vmov 0.0   ;;  %vm464_vm0 = vmmov 0   ;;  %v413_v1 = vld [vmem:[#allocation2] sm:$0xff]   ;;  %vm41_vm1 = vcmask 130048   ;;  %v31_v14 = vlaneseq }
   0xe   :  { %362 = vmatprep.subr.bf16.mxu0 %v463_v0  ;;  %364 = vmatprep.mubr.msk.bf16.mxu0 %vm464_vm0, %v463_v0  ;;  %v26_v2 = vld [vmem:[%s509_s0] sm:$0xf]  ;;  %v414_v3 = vld [vmem:[#allocation2 + $0x48] sm:$0xff]   ;;  %v416_v5 = vld [vmem:[#allocation2 + $0x38] sm:$0xff]  }
   0xf   :  { %368 = vmatprep.subr.bf16.mxu1 %v463_v0  ;;  %384 = vmatprep.mubr.msk.bf16.mxu1 %vm464_vm0, %v463_v0  ;;  %v415_v4 = vld [vmem:[#allocation2 + $0x40] sm:$0xff]   ;;  %v417_v6 = vld [vmem:[#allocation2 + $0x30] sm:$0xff]   ;;  %v418_v7 = vld [vmem:[#allocation2 + $0x28] sm:$0xff]   ;;  %v32_v15 = vshrl.u32 %v31_v14, 7  ;;  %v310_v53 = vand.u32 127, %v31_v14 }
  0x10   :  { %363 = vmatpush3.bf16.msra.mxu0 %v413_v1  ;;  %369 = vmatpush3.bf16.msra.mxu1 %v414_v3  ;;  %v419_v8 = vld [vmem:[#allocation2 + $0x20] sm:$0xff]   ;;  %v420_v9 = vld [vmem:[#allocation2 + $0x18] sm:$0xff]   ;;  %v421_v10 = vld [vmem:[#allocation2 + $0x10] sm:$0xff]  }
  0x11   :  { %388 = vmatprep.subr.bf16.mxu0 %v463_v0  ;;  %370 = vmatprep.subr.bf16.mxu1 %v463_v0  ;;  %v422_v11 = vld [vmem:[#allocation2 + $0x90] sm:$0xff]   ;;  %v423_v12 = vld [vmem:[#allocation2 + $0x88] sm:$0xff]   ;;  %v424_v13 = vld [vmem:[#allocation2 + $0x80] sm:$0xff]   ;;  %v33_v18 = vsub.s32 0, %v32_v15  ;;  %vm311_vm2 = vcmp.lt.s32.totalorder %v310_v53, 8 }
  0x12   :  { %v29_v16 = vld [vmem:[#allocation2 + $0x8] sm:$0x1]  ;;  %v425_v27 = vld [vmem:[#allocation2 + $0x78] sm:$0xff]   ;;  %v426_v28 = vld [vmem:[#allocation2 + $0x70] sm:$0xff]  }
  0x13   :  { %365 = vmatmul.mubr.msk.bf16.vlgmr.msra.gmra.mxu0 %vm41_vm1, %v26_v2  ;;  %v30_v17 = vunpack.c.l.bf16 %v29_v16  ;;  %v427_v29 = vld [vmem:[#allocation2 + $0x68] sm:$0xff]   ;;  %v428_v30 = vld [vmem:[#allocation2 + $0x60] sm:$0xff]   ;;  %v429_v31 = vld [vmem:[#allocation2 + $0x58] sm:$0xff]  }
  0x14   :  { %404 = vmatprep.mubr.msk.bf16.mxu0 %vm464_vm0, %v463_v0  ;;  %371 = vmatpush3.bf16.msra.mxu1 %v415_v4  ;;  %v103_v32 = vld [vmem:[#allocation2 + $0x50] sm:$0x1]  ;;  %v215_v42 = vld [vmem:[#allocation2 + $0x98] sm:$0x1] }
  0x15   :  { %372 = vmatprep.subr.bf16.mxu1 %v463_v0  ;;  %389 = vmatpush3.bf16.msra.mxu0 %v422_v11  ;;  %v34_v19 = vrot.slane %v30_v17, %v33_v18  ;;  %v104_v33 = vunpack.c.l.bf16 %v103_v32  ;;  %v216_v43 = vunpack.c.l.bf16 %v215_v42 }
  0x16   :  { %390 = vmatprep.subr.bf16.mxu0 %v463_v0 }
  0x17   :  { %v108_v34 = vrot.slane %v104_v33, %v33_v18  ;;  %v220_v44 = vrot.slane %v216_v43, %v33_v18 }
  0x18   :  { %373 = vmatpush3.bf16.msra.mxu1 %v416_v5 }
  0x19   :  { %374 = vmatprep.subr.bf16.mxu1 %v463_v0  ;;  %391 = vmatpush3.bf16.msra.mxu0 %v423_v12 }
  0x1a   :  { %392 = vmatprep.subr.bf16.mxu0 %v463_v0 }
  0x1c   :  { %375 = vmatpush3.bf16.msra.mxu1 %v417_v6 }
  0x1d   :  { %376 = vmatprep.subr.bf16.mxu1 %v463_v0  ;;  %393 = vmatpush3.bf16.msra.mxu0 %v424_v13 }
  0x1e   :  { %394 = vmatprep.subr.bf16.mxu0 %v463_v0 }
  0x20   :  { %377 = vmatpush3.bf16.msra.mxu1 %v418_v7 }
  0x21   :  { %378 = vmatprep.subr.bf16.mxu1 %v463_v0  ;;  %395 = vmatpush3.bf16.msra.mxu0 %v425_v27 }
  0x22   :  { %396 = vmatprep.subr.bf16.mxu0 %v463_v0 }
  0x24   :  { %379 = vmatpush3.bf16.msra.mxu1 %v419_v8 }
  0x25   :  { %380 = vmatprep.subr.bf16.mxu1 %v463_v0  ;;  %397 = vmatpush3.bf16.msra.mxu0 %v426_v28 }
  0x26   :  { %398 = vmatprep.subr.bf16.mxu0 %v463_v0 }
  0x28   :  { %381 = vmatpush3.bf16.msra.mxu1 %v420_v9 }
  0x29   :  { %382 = vmatprep.subr.bf16.mxu1 %v463_v0  ;;  %399 = vmatpush3.bf16.msra.mxu0 %v427_v29 }
  0x2a   :  { %400 = vmatprep.subr.bf16.mxu0 %v463_v0 }
  0x2c   :  { %383 = vmatpush3.bf16.msra.mxu1 %v421_v10 }
  0x2d   :  { %401 = vmatpush3.bf16.msra.mxu0 %v428_v30 }
  0x2e   :  { %402 = vmatprep.subr.bf16.mxu0 %v463_v0 }
  0x31   :  { %403 = vmatpush3.bf16.msra.mxu0 %v429_v31 }
  0xd3   :  { %v79_v20 = vpop.f32.mrf.mxu0 }
  0xd4   :  { %v80_v21 = vadd.f32 %v79_v20, %v34_v19 }
  0xd5   :  { %v366_v22 = vpop.f32.mrf.mxu0 }
  0xd6   :  { %430 = vtanh.f32 %v80_v21 }
  0xd7   :  { %v82_v23 = vpop.f32.mrf.mxu0 }
  0xd9   :  { %v367_v24 = vpop.f32.mrf.mxu0 }
  0xe3   :  { %v431_v25 = vpop.eup %430 }
  0xe4   :  { %v86_v26 = vpack.c.bf16 %v431_v25, %v431_v25 }
  0xe6   :  { %385 = vmatmul.mubr.bf16.vlgmr.msra.gmra.mxu1 %v86_v26 }
 0x1a6   :  { %v191_v35 = vpop.f32.mrf.mxu1 }
 0x1a7   :  { %v192_v36 = vadd.f32 %v191_v35, %v108_v34 }
 0x1a8   :  { %v386_v37 = vpop.f32.mrf.mxu1 }
 0x1a9   :  { %432 = vtanh.f32 %v192_v36 }
 0x1aa   :  { %v194_v38 = vpop.f32.mrf.mxu1 }
 0x1ac   :  { %v387_v39 = vpop.f32.mrf.mxu1 }
 0x1b6   :  { %v433_v40 = vpop.eup %432 }
 0x1b7   :  { %v198_v41 = vpack.c.bf16 %v433_v40, %v433_v40 }
 0x1b9   :  { %405 = vmatmul.mubr.bf16.vlgmr.msra.gmra.mxu0 %v198_v41 }
 0x279   :  { %v303_v45 = vpop.f32.mrf.mxu0 }
 0x27a   :  { %v304_v46 = vadd.f32 %v303_v45, %v220_v44 }
 0x27b   :  { %v406_v47 = vpop.f32.mrf.mxu0 }
 0x27c   :  { %v313_v48 = vmax.f32 %v304_v46, 0.0  ;;  %434 = vtanh.f32 %v304_v46 }
 0x27d   :  { %v306_v49 = vpop.f32.mrf.mxu0 }
 0x27e   :  { %v314_v50 = vsub.f32 0.0, %v313_v48 }
 0x27f   :  { %v407_v51 = vpop.f32.mrf.mxu0 }
 0x280   :  { %v315_v52 = vmul.f32 1.442695, %v314_v50 }
 0x282   :  { %436 = vpow2.f32 %v315_v52 }
 0x289   :  { %v435_v54 = vpop.eup %434 }
 0x28f   :  { %v437_v55 = vpop.eup %436 }
 0x290   :  { %v317_v56 = vsel %vm311_vm2, %v435_v54, %v437_v55 }
 0x291   :  { %318 = vst [vmem:[%s511_s2] sm:$0xff] %v317_v56 }
 0x292   :  { %323 = vsyncpa [#allocation3], 1 }

</bundles_post_ra>
